<compile_context>
chip_gen: v7x
topology: tpu7x:2x2x1
jax: 0.10.0
libtpu: 0.0.40
codegen_flags: <defaults>
</compile_context>

<pallas_src>
import math

import jax
import jax.numpy as jnp
from jax.experimental import pallas as pl
from jax.experimental.pallas import tpu as pltpu


def _location_layer_kernel(x_ref, wf_ref, o_ref, u_ref):
    """One grid step = BB batch rows x one T-tile.

    x_ref : (BB, Tpad, 2)  zero-padded, channels-last input; resident across
                           the T-tile axis (index_map ignores ti).
    wf_ref: (2K, D)        folded conv+dense weight, activation dtype, resident.
    o_ref : (BB, tT, D)    output tile (lane-dense along D).
    u_ref : (BB, tT, 2K)   VMEM scratch: unfolded (im2col) conv operand.
    """
    BB, tT, _ = o_ref.shape
    K = wf_ref.shape[0] // 2
    # Element offset of this T-tile inside the resident padded input.
    t0 = pl.multiple_of(pl.program_id(1) * tT, tT)

    # Unfold: U[b, t, 2k + c] = x[b, t0 + t + k, c].
    # Ref-level window load -> ref-level store at a static lane offset; no
    # concat temporaries (review option B).
    for k in range(K):
        u_ref[:, :, 2 * k:2 * k + 2] = x_ref[:, pl.ds(t0 + k, tT), :]

    # Fused Conv1d + Linear: one (tT, 2K) @ (2K, D) MXU matmul per batch row,
    # pure activation-dtype operands, f32 accumulation.
    wf = wf_ref[...]
    for b in range(BB):
        acc = jnp.dot(u_ref[b], wf, preferred_element_type=jnp.float32)
        o_ref[b] = acc.astype(o_ref.dtype)


def fold_location_layer_weights(conv_weight, dense_weight, dtype):
    """Fold Conv1d(2,F,K) and Linear(F,D) weights into one (2K, D) matrix.

    Wf[2k + c, d] = sum_f conv_weight[f, c, k] * dense_weight[d, f]

    Do this ONCE per sequence / checkpoint load, not once per decoder step.
    """
    F_, C, K = conv_weight.shape
    D = dense_weight.shape[0]
    w = jnp.einsum("fck,df->kcd", conv_weight, dense_weight,
                   precision=jax.lax.Precision.HIGHEST)
    return w.reshape(K * C, D).astype(dtype)


def location_layer_apply(attention_weights_cat, w_folded):
    """attention_weights_cat: (B, 2, T); w_folded: (2K, D). Returns (B, T, D)."""
    B, C_in, T = attention_weights_cat.shape
    assert C_in == 2
    K2, D = w_folded.shape
    K = K2 // C_in
    # Even K with pad=(K-1)//2 changes PyTorch conv semantics.
    assert K % 2 == 1, "attention_kernel_size must be odd"
    pad = (K - 1) // 2

    # Tiling: biggest row block that fits comfortably on every chip generation
    # (f32 accumulator <= ~2 MiB at D=128, output double-buffering included).
    tT = T if T <= 512 else 512
    nT = pl.cdiv(T, tT)
    rows_per_step = 4096
    BB = max(1, min(B, rows_per_step // tT))
    while B % BB:            # keep batch blocks exact (worst case BB == 1)
        BB -= 1
    nB = B // BB

    # Channels-last + zero time padding (matches Conv1d zero padding).  Extra
    # tail zeros make every (tT + K - 1) window of the last T-tile in bounds.
    x = jnp.transpose(attention_weights_cat, (0, 2, 1))            # (B, T, 2)
    t_total = nT * tT
    x_pad = jnp.pad(x, ((0, 0), (pad, pad + (t_total - T)), (0, 0)))
    Tpad = t_total + K - 1                                         # x_pad.shape[1]

    return pl.pallas_call(
        _location_layer_kernel,
        out_shape=jax.ShapeDtypeStruct((B, T, D), attention_weights_cat.dtype),
        grid_spec=pltpu.PrefetchScalarGridSpec(
            num_scalar_prefetch=0,
            grid=(nB, nT),
            in_specs=[
                # Full padded time stays resident across ti (2 lanes only).
                pl.BlockSpec((BB, Tpad, C_in), lambda bi, ti: (bi, 0, 0)),
                # Folded weight resident for the whole kernel.
                pl.BlockSpec((K2, D), lambda bi, ti: (0, 0)),
            ],
            out_specs=pl.BlockSpec((BB, tT, D), lambda bi, ti: (bi, ti, 0)),
            scratch_shapes=[
                pltpu.VMEM((BB, tT, K2), attention_weights_cat.dtype)],
        ),
        compiler_params=pltpu.CompilerParams(
            dimension_semantics=("parallel", "parallel")),
    )(x_pad, w_folded)


def location_layer_forward(attention_weights_cat, conv_weight, dense_weight):
    """Convenience wrapper (folds weights every call).  In a decoder loop call
    fold_location_layer_weights once and reuse location_layer_apply."""
    w_folded = fold_location_layer_weights(
        conv_weight, dense_weight, attention_weights_cat.dtype)
    return location_layer_apply(attention_weights_cat, w_folded)


def _xavier_uniform(key, shape, fan_in, fan_out, gain):
    bound = gain * math.sqrt(6.0 / (fan_in + fan_out))
    return jax.random.uniform(key, shape, jnp.float32, -bound, bound)


def _reference(attention_weights_cat, conv_weight, dense_weight):
    # Pure-JAX reference mirroring the PyTorch forward (un-fused, f32).
    conv = jax.lax.conv_general_dilated(
        attention_weights_cat, conv_weight,
        window_strides=(1,),
        padding=[((conv_weight.shape[-1] - 1) // 2,) * 2],
        dimension_numbers=("NCH", "OIH", "NCH"))          # (B, F, T)
    proc = jnp.transpose(conv, (0, 2, 1))                 # (B, T, F)
    return jnp.einsum("btf,df->btd", proc, dense_weight)  # (B, T, D)


if __name__ == "__main__":
    key = jax.random.PRNGKey(0)
    k1, k2, k3, k4, k5, k6 = jax.random.split(key, 6)

    # --- Test 1: small f32 shapes (single grid step) ------------------------
    B, T = 2, 16
    n_filters, ksize, attn_dim = 8, 3, 16
    conv_w = _xavier_uniform(k1, (n_filters, 2, ksize),
                             fan_in=2 * ksize, fan_out=n_filters * ksize,
                             gain=1.0)
    dense_w = _xavier_uniform(k2, (attn_dim, n_filters),
                              fan_in=n_filters, fan_out=attn_dim,
                              gain=5.0 / 3.0)
    x = jax.random.normal(k3, (B, 2, T), jnp.float32)

    out = jax.block_until_ready(location_layer_forward(x, conv_w, dense_w))
    ref = _reference(x, conv_w, dense_w)
    assert out.shape == (B, T, attn_dim)
    assert jnp.allclose(out, ref, atol=1e-4, rtol=1e-4)

    # --- Test 2: production-like dims (K=31, D=128), bf16 activations -------
    B2, T2 = 4, 64
    n_filters2, ksize2, attn_dim2 = 32, 31, 128
    conv_w2 = _xavier_uniform(k4, (n_filters2, 2, ksize2),
                              fan_in=2 * ksize2, fan_out=n_filters2 * ksize2,
                              gain=1.0)
    dense_w2 = _xavier_uniform(k5, (attn_dim2, n_filters2),
                               fan_in=n_filters2, fan_out=attn_dim2,
                               gain=5.0 / 3.0)
    x2 = jax.random.normal(k6, (B2, 2, T2), jnp.float32).astype(jnp.bfloat16)

    out2 = jax.block_until_ready(location_layer_forward(x2, conv_w2, dense_w2))
    ref2 = _reference(x2.astype(jnp.float32), conv_w2, dense_w2)
    assert out2.shape == (B2, T2, attn_dim2)
    assert jnp.allclose(out2.astype(jnp.float32), ref2, atol=5e-2, rtol=5e-2)

    print("KERNEL_OK")
</pallas_src>

<mosaic_0001>
module attributes {stable_mosaic.version = 11 : i64} {
  func.func @_location_layer_kernel(%arg0: i32, %arg1: i32, %arg2: memref<2x18x2xf32, #tpu.memory_space<vmem>>, %arg3: memref<6x16xf32, #tpu.memory_space<vmem>>, %arg4: memref<2x16x16xf32, #tpu.memory_space<vmem>>, %arg5: memref<2x16x6xf32, #tpu.memory_space<vmem>>) attributes {dimension_semantics = [#tpu.dimension_semantics<parallel>, #tpu.dimension_semantics<parallel>], iteration_bounds = array<i64: 1, 1>, scalar_prefetch = 0 : i64, scratch_operands = 1 : i64, tpu.core_type = #tpu.core_type<tc>, window_params = [{transform_indices = @transform_0, window_bounds = array<i64: 2, 18, 2>}, {pipeline_mode = #tpu.pipeline_mode<synchronous>, transform_indices = @transform_1, window_bounds = array<i64: 6, 16>}, {transform_indices = @transform_2, window_bounds = array<i64: 2, 16, 16>}]} {
    %c16_i32 = arith.constant 16 : i32
    %0 = arith.muli %arg1, %c16_i32 : i32
    %1 = tpu.assume_multiple %0, 16 : i32
    %c0_i32 = arith.constant 0 : i32
    %2 = arith.addi %1, %c0_i32 : i32
    %c0 = arith.constant 0 : index
    %3 = arith.index_cast %2 : i32 to index
    %c0_0 = arith.constant 0 : index
    %4 = vector.load %arg2[%c0, %3, %c0_0] : memref<2x18x2xf32, #tpu.memory_space<vmem>>, vector<2x16x2xf32>
    %c0_1 = arith.constant 0 : index
    %c0_2 = arith.constant 0 : index
    %c0_3 = arith.constant 0 : index
    %5 = vector.load %arg5[%c0_1, %c0_2, %c0_3] : memref<2x16x6xf32, #tpu.memory_space<vmem>>, vector<2x16x2xf32>
    tpu.vector_store %arg5[%c0_1, %c0_2, %c0_3], %4 {strides = array<i32>} : memref<2x16x6xf32, #tpu.memory_space<vmem>>, vector<2x16x2xf32>,
    %c1_i32 = arith.constant 1 : i32
    %6 = arith.addi %1, %c1_i32 : i32
    %c0_4 = arith.constant 0 : index
    %7 = arith.index_cast %6 : i32 to index
    %c0_5 = arith.constant 0 : index
    %8 = vector.load %arg2[%c0_4, %7, %c0_5] : memref<2x18x2xf32, #tpu.memory_space<vmem>>, vector<2x16x2xf32>
    %c0_6 = arith.constant 0 : index
    %c0_7 = arith.constant 0 : index
    %c2 = arith.constant 2 : index
    %9 = vector.load %arg5[%c0_6, %c0_7, %c2] : memref<2x16x6xf32, #tpu.memory_space<vmem>>, vector<2x16x2xf32>
    tpu.vector_store %arg5[%c0_6, %c0_7, %c2], %8 {strides = array<i32>} : memref<2x16x6xf32, #tpu.memory_space<vmem>>, vector<2x16x2xf32>,
    %c2_i32 = arith.constant 2 : i32
    %10 = arith.addi %1, %c2_i32 : i32
    %c0_8 = arith.constant 0 : index
    %11 = arith.index_cast %10 : i32 to index
    %c0_9 = arith.constant 0 : index
    %12 = vector.load %arg2[%c0_8, %11, %c0_9] : memref<2x18x2xf32, #tpu.memory_space<vmem>>, vector<2x16x2xf32>
    %c0_10 = arith.constant 0 : index
    %c0_11 = arith.constant 0 : index
    %c4 = arith.constant 4 : index
    %13 = vector.load %arg5[%c0_10, %c0_11, %c4] : memref<2x16x6xf32, #tpu.memory_space<vmem>>, vector<2x16x2xf32>
    tpu.vector_store %arg5[%c0_10, %c0_11, %c4], %12 {strides = array<i32>} : memref<2x16x6xf32, #tpu.memory_space<vmem>>, vector<2x16x2xf32>,
    %c0_12 = arith.constant 0 : index
    %c0_13 = arith.constant 0 : index
    %14 = vector.load %arg3[%c0_12, %c0_13] : memref<6x16xf32, #tpu.memory_space<vmem>>, vector<6x16xf32>
    %c0_14 = arith.constant 0 : index
    %c0_15 = arith.constant 0 : index
    %c0_16 = arith.constant 0 : index
    %15 = vector.load %arg5[%c0_14, %c0_15, %c0_16] : memref<2x16x6xf32, #tpu.memory_space<vmem>>, vector<1x16x6xf32>
    %16 = vector.shape_cast %15 : vector<1x16x6xf32> to vector<16x6xf32>
    %cst = arith.constant dense<0.000000e+00> : vector<16x16xf32>
    %17 = tpu.matmul %16, %14, %cst {dimension_numbers = #tpu.dot_dimension_numbers<[1], [0], [0], [1], [0, 0, 1, 1], [], []>} : vector<16x6xf32>, vector<6x16xf32>, vector<16x16xf32> -> vector<16x16xf32>
    %c0_17 = arith.constant 0 : index
    %c0_18 = arith.constant 0 : index
    %c0_19 = arith.constant 0 : index
    %18 = vector.load %arg4[%c0_17, %c0_18, %c0_19] : memref<2x16x16xf32, #tpu.memory_space<vmem>>, vector<1x16x16xf32>
    %19 = vector.shape_cast %18 : vector<1x16x16xf32> to vector<16x16xf32>
    %20 = vector.shape_cast %17 : vector<16x16xf32> to vector<1x16x16xf32>
    tpu.vector_store %arg4[%c0_17, %c0_18, %c0_19], %20 {strides = array<i32>} : memref<2x16x16xf32, #tpu.memory_space<vmem>>, vector<1x16x16xf32>,
    %c1 = arith.constant 1 : index
    %c0_20 = arith.constant 0 : index
    %c0_21 = arith.constant 0 : index
    %21 = vector.load %arg5[%c1, %c0_20, %c0_21] : memref<2x16x6xf32, #tpu.memory_space<vmem>>, vector<1x16x6xf32>
    %22 = vector.shape_cast %21 : vector<1x16x6xf32> to vector<16x6xf32>
    %cst_22 = arith.constant dense<0.000000e+00> : vector<16x16xf32>
    %23 = tpu.matmul %22, %14, %cst_22 {dimension_numbers = #tpu.dot_dimension_numbers<[1], [0], [0], [1], [0, 0, 1, 1], [], []>} : vector<16x6xf32>, vector<6x16xf32>, vector<16x16xf32> -> vector<16x16xf32>
    %c1_23 = arith.constant 1 : index
    %c0_24 = arith.constant 0 : index
    %c0_25 = arith.constant 0 : index
    %24 = vector.load %arg4[%c1_23, %c0_24, %c0_25] : memref<2x16x16xf32, #tpu.memory_space<vmem>>, vector<1x16x16xf32>
    %25 = vector.shape_cast %24 : vector<1x16x16xf32> to vector<16x16xf32>
    %26 = vector.shape_cast %23 : vector<16x16xf32> to vector<1x16x16xf32>
    tpu.vector_store %arg4[%c1_23, %c0_24, %c0_25], %26 {strides = array<i32>} : memref<2x16x16xf32, #tpu.memory_space<vmem>>, vector<1x16x16xf32>,
    return
  }
  func.func @transform_0(%arg0: i32, %arg1: i32) -> (i32, i32, i32) {
    %c0_i32 = arith.constant 0 : i32
    %c0_i32_0 = arith.constant 0 : i32
    %c0_i32_1 = arith.constant 0 : i32
    return %arg0, %c0_i32, %c0_i32_0 : i32, i32, i32
  }
  func.func @transform_1(%arg0: i32, %arg1: i32) -> (i32, i32) {
    %c0_i32 = arith.constant 0 : i32
    %c0_i32_0 = arith.constant 0 : i32
    %c0_i32_1 = arith.constant 0 : i32
    return %c0_i32, %c0_i32_0 : i32, i32
  }
  func.func @transform_2(%arg0: i32, %arg1: i32) -> (i32, i32, i32) {
    %c0_i32 = arith.constant 0 : i32
    %c0_i32_0 = arith.constant 0 : i32
    return %arg0, %arg1, %c0_i32 : i32, i32, i32
  }
}

</mosaic_0001>

<bundles_post_ra>
// kernel: tpu_custom_call.1
= control target key start
LH: loop header
LB: loop body
LE: loop exit
PB: predicated region body
PF: predicated region fallthrough
CT: control target
= control target key end

     0   :  { %s333_s13 = smov 2   ;;  %vm18_vm0 = vcmask 15360   ;;  %vm87_vm1 = vcmask 1045504   ;;  %s404_s0 = inlined_call_operand.vmem [shape: f32[2,18,2], index: 0, kind: input, shape index: {}]   ;;  %s405_s1 = inlined_call_operand.vmem [shape: f32[6,16], index: 1, kind: input, shape index: {}]   ;;  %s406_s2 = inlined_call_operand.hbm [shape: f32[2,16,16], index: 2, kind: output, shape index: {}]  }
   0x1   :  { %v275_v0 = vld [vmem:[%s404_s0 + $0x9] sm:$0xff]  ;;  %v274_v1 = vld [vmem:[%s404_s0 + $0x1] sm:$0xff]  ;;  %v276_v3 = vld [vmem:[%s404_s0 + $0x19] sm:$0xff] }
   0x2   :  { %35 = vrot.lane.b32.xlu1 %v275_v0, %s333_s13  ;;  %33 = vrot.lane.b32.xlu0 %v274_v1, %s333_s13  ;;  %v277_v2 = vld [vmem:[%s404_s0 + $0x21] sm:$0xff]  ;;  %v16_v7 = vld [vmem:[%s404_s0 + $0x18] sm:$0xff] }
   0x3   :  { %v15_v4 = vld [vmem:[%s404_s0 + $0x8] sm:$0xff]  ;;  %v14_v5 = vld [vmem:[%s404_s0] sm:$0xff] }
   0x4   :  { %v17_v6 = vld [vmem:[%s404_s0 + $0x20] sm:$0xff]  ;;  %20 = vst.msk [vmem:[#allocation2 + $0x8] sm:$0xff] %vm18_vm0, %v15_v4  ;;  %19 = vst.msk [vmem:[#allocation2] sm:$0xff] %vm18_vm0, %v14_v5 }
   0x5   :  { %22 = vst.msk [vmem:[#allocation2 + $0x18] sm:$0xff] %vm18_vm0, %v17_v6  ;;  %v77_v8 = vld [vmem:[%s405_s1] sm:$0x3f] }
   0x6   :  { %7 = vsyncpa [#allocation4], 0  ;;  %39 = vrot.lane.b32.xlu1 %v277_v2, %s333_s13  ;;  %37 = vrot.lane.b32.xlu0 %v276_v3, %s333_s13  ;;  %21 = vst.msk [vmem:[#allocation2 + $0x10] sm:$0xff] %vm18_vm0, %v16_v7  ;;  %v280_v9 = vld [vmem:[%s404_s0 + $0x1a] sm:$0xff]  ;;  %v278_v10 = vld [vmem:[%s404_s0 + $0x2] sm:$0xff]  ;;  %s334_s4 = smov 4  }
   0x7   :  { %294 = vmatprep.subr.msk.mxu0 %vm87_vm1, %v77_v8  ;;  %299 = vmatprep.subr.msk.mxu1 %vm87_vm1, %v77_v8  ;;  %v281_v11 = vld [vmem:[%s404_s0 + $0x22] sm:$0xff]  ;;  %v279_v12 = vld [vmem:[%s404_s0 + $0xa] sm:$0xff]  ;;  %vm45_vm2 = vcmask 31760   ;;  %vm72_vm3 = vcmask 48160   ;;  %vm80_vm4 = vcmask 48128   ;;  %s335_s0 = smov [#allocation3]  }
   0x8   :  { %295 = vmatpush3.msk.msra.mxu0 %vm87_vm1, %v77_v8  ;;  %300 = vmatpush3.msk.msra.mxu1 %vm87_vm1, %v77_v8  ;;  %s261_s8 = sshll.u32 %s335_s0, 4  ;;  %vm166_vm5 = vcmask 130048   ;;  %s262_s8 = int_to_ptr.vmem [resolvable:$true] %s261_s8 }
   0x9   :  { %s309_s9 = scalar_lea.vmem %s262_s8, 512  ;;  %p314_p1 = scmp.lt.s32.totalorder %s262_s8, %s262_s8 }
   0xa   :  { %64 = vrot.lane.b32.xlu1 %v280_v9, %s334_s4  ;;  %60 = vrot.lane.b32.xlu0 %v278_v10, %s334_s4  ;;  %p310_p0 = scmp.ne.s32.totalorder %s262_s8, %s309_s9  ;;  %p315_p2 = scmp.lt.s32.totalorder %s309_s9, %s309_s9 }
   0xc   :  { %p316_p3 = por %p315_p2, %p314_p1 }
   0xe   :  { %66 = vrot.lane.b32.xlu1 %v281_v11, %s334_s4  ;;  %62 = vrot.lane.b32.xlu0 %v279_v12, %s334_s4  ;;  %p317_p4 = pnand %p316_p3, %p310_p0 }
  0x74   :  { %v36_v13 = vpop.permute.xlu1 %35  ;;  %v34_v14 = vpop.permute.xlu0 %33 }
  0x75   :  { %47 = vst.msk [vmem:[#allocation2 + $0x8] sm:$0xff] %vm45_vm2, %v36_v13  ;;  %46 = vst.msk [vmem:[#allocation2] sm:$0xff] %vm45_vm2, %v34_v14 }
  0x78   :  { %v40_v15 = vpop.permute.xlu1 %39  ;;  %v38_v16 = vpop.permute.xlu0 %37 }
  0x79   :  { %49 = vst.msk [vmem:[#allocation2 + $0x18] sm:$0xff] %vm45_vm2, %v40_v15  ;;  %48 = vst.msk [vmem:[#allocation2 + $0x10] sm:$0xff] %vm45_vm2, %v38_v16 }
  0x7c   :  { %v65_v17 = vpop.permute.xlu1 %64  ;;  %v61_v18 = vpop.permute.xlu0 %60 }
  0x7d   :  { %75 = vst.msk [vmem:[#allocation2 + $0x10] sm:$0xff] %vm72_vm3, %v65_v17  ;;  %73 = vst.msk [vmem:[#allocation2] sm:$0xff] %vm72_vm3, %v61_v18 }
  0x80   :  { %v67_v19 = vpop.permute.xlu1 %66  ;;  %v63_v20 = vpop.permute.xlu0 %62 }
  0x81   :  { %76 = vst.msk [vmem:[#allocation2 + $0x18] sm:$0xff] %vm72_vm3, %v67_v19  ;;  %74 = vst.msk [vmem:[#allocation2 + $0x8] sm:$0xff] %vm72_vm3, %v63_v20 }
  0x84   :  { %v78_v21 = vld [vmem:[#allocation2] sm:$0xff]  ;;  %v170_v22 = vld [vmem:[#allocation2 + $0x10] sm:$0xff] }
  0x85   :  { %296 = vmatprep.mubr.msk.f32.mxu0 %vm80_vm4, %v78_v21  ;;  %301 = vmatprep.mubr.msk.f32.mxu1 %vm80_vm4, %v170_v22 }
  0x88   :  { %v79_v23 = vld [vmem:[#allocation2 + $0x8] sm:$0xff]  ;;  %v171_v24 = vld [vmem:[#allocation2 + $0x18] sm:$0xff] }
  0x89   :  { %297 = vmatmul.mubr.msk.f32.vlgmr.msra.gmra.mrb[0].mxu0 %vm80_vm4, %v79_v23  ;;  %302 = vmatmul.mubr.msk.f32.vlgmr.msra.gmra.mrb[0].mxu1 %vm80_vm4, %v171_v24 }
 0x15c   :  { %v298_v25 = vpop.f32.mrb[0].mxu0  ;;  %v303_v26 = vpop.f32.mrb[0].mxu1 }
 0x15d   :  { %168 = vst.msk [vmem:[#allocation3 + $0x8] sm:$0xff] %vm166_vm5, %v298_v25  ;;  %255 = vst.msk [vmem:[#allocation3 + $0x18] sm:$0xff] %vm166_vm5, %v303_v26  ;;  %v157_v27 = vpop.f32.mrb[1].mxu0  ;;  %v244_v28 = vpop.f32.mrb[1].mxu1 }
 0x15e   :  { %167 = vst.msk [vmem:[#allocation3] sm:$0xff] %vm166_vm5, %v157_v27  ;;  %254 = vst.msk [vmem:[#allocation3 + $0x10] sm:$0xff] %vm166_vm5, %v244_v28 }
 0x15f   :  { %320 = shalt.err (!%p317_p4)
}
 0x160   :  { %s321_s12 = scalar_lea.hbm %s406_s2, 512 }
 0x161   :  { %p322_p5 = scmp.ne.s32.totalorder %s406_s2, %s321_s12  ;;  %p325_p6 = scmp.lt.u32.totalorder %s321_s12, %s406_s2 }
 0x163   :  { %p327_p7 = pnand %p325_p6, %p322_p5 }
 0x165   :  { %330 = shalt.err (!%p327_p7)
}
 0x166   :  { %s336_s17 = smov 128   ;;  %s337_s18 = smov 8  }
 0x167   :  { %267 = dma.vmem_to_hbm [thread:$0]  %s262_s8, 512, %s406_s2, [#allocation4], %s336_s17, %s336_s17, %s337_s18  }
 0x168   :  { %331 = dma.done.wait [#allocation4], 512  }
 0x169   :  { %332 = vsyncadd [#allocation4], 4294966784 }
 0x16a   :  { %271 = vsyncpa [#allocation4], 1 }

</bundles_post_ra>
